<compile_context>
chip_gen: v7x
topology: tpu7x:2x2x1
jax: 0.10.0
libtpu: 0.0.40
codegen_flags: <defaults>
</compile_context>

<pallas_src>
import functools

import jax
import jax.numpy as jnp
from jax.experimental import pallas as pl
from jax.experimental.pallas import tpu as pltpu


# ~0.5M elements per block: 2 MiB f32 / 1 MiB bf16. Double-buffered input and
# output -> <= 8 MiB VMEM, safe under every chip's *default* scoped-VMEM limit
# (v5e 16 MiB, v6e/v7x 32 MiB), already at the ~85% HBM-roofline knee.
_TARGET_BLOCK_ELEMS = 256 * 2048


def _pow_static(x, e):
    """x**e for a small static non-negative int e, via square-and-multiply."""
    if e == 0:
        return jnp.ones_like(x)
    if e == 1:
        return x
    half = _pow_static(x, e // 2)
    sq = half * half
    return sq * x if (e % 2) else sq


def _envelope_kernel(x_ref, o_ref, *, p, a, b, c):
    # Stream original dtype from HBM; compute in f32 in-register.
    x = x_ref[...].astype(jnp.float32)

    # 1/x: initial estimate on the EUP slot (exact, approx=False by default).
    inv_x = pl.reciprocal(x)

    # x^(p-1) via static square-and-multiply (p is a small static int).
    x_pm1 = _pow_static(x, p - 1)

    # Horner on the tail: a*x^(p-1) + b*x^p + c*x^(p+1) = x^(p-1)*(a + x*(b + c*x))
    env_val = inv_x + x_pm1 * (a + x * (b + c * x))

    # No row mask for the partial last block: Pallas clips the writeback to
    # the logical array bounds, so inf/NaN from garbage rows is never stored.
    o_ref[...] = jnp.where(x < 1.0, env_val, 0.0).astype(o_ref.dtype)


def _pick_width(n):
    """Largest lane-dense width (multiple of 128) that divides n, else 128."""
    for w in (2048, 1024, 512, 256, 128):
        if n % w == 0:
            return w
    return 128


def envelope(inputs, exponent):
    """JAX/Pallas equivalent of Envelope(exponent)(inputs)."""
    p = exponent + 1
    a = -(p + 1) * (p + 2) / 2.0
    b = float(p * (p + 2))
    c = -p * (p + 1) / 2.0

    orig_shape = inputs.shape
    x = inputs
    # Integer inputs are NOT cast here: the kernel casts in-register, which
    # avoids a separate full-HBM-pass astype op. Output is f32 in that case.
    if jnp.issubdtype(x.dtype, jnp.floating):
        out_dtype = x.dtype
    else:
        out_dtype = jnp.float32

    flat = x.reshape(-1)          # free (contiguous)
    n = flat.shape[0]

    width = _pick_width(n)
    pad = (-n) % width
    if pad:
        # TODO(synk): ragged (n % 128 != 0) path still pads + slices (2 extra
        # HBM passes); replace with an in-kernel lane mask if it matters.
        # Pad value 2.0 (>= 1) evaluates to exactly 0 and avoids 1/0.
        flat = jnp.pad(flat, (0, pad), constant_values=2)
    rows = (n + pad) // width

    target_rows = max(8, (_TARGET_BLOCK_ELEMS // width) // 8 * 8)
    block_rows = rows if rows <= target_rows else target_rows
    grid = pl.cdiv(rows, block_rows)

    kernel = functools.partial(_envelope_kernel, p=p, a=a, b=b, c=c)

    x2d = flat.reshape(rows, width)   # free (contiguous)
    n_elems = rows * width
    cost = pl.CostEstimate(
        flops=12 * n_elems,
        transcendentals=n_elems,
        bytes_accessed=n_elems * (x2d.dtype.itemsize
                                  + jnp.dtype(out_dtype).itemsize))

    out2d = pl.pallas_call(
        kernel,
        out_shape=jax.ShapeDtypeStruct((rows, width), out_dtype),
        grid_spec=pltpu.PrefetchScalarGridSpec(
            num_scalar_prefetch=0,
            grid=(grid,),
            in_specs=[pl.BlockSpec((block_rows, width), lambda i: (i, 0))],
            out_specs=pl.BlockSpec((block_rows, width), lambda i: (i, 0)),
        ),
        compiler_params=pltpu.CompilerParams(
            dimension_semantics=("parallel",)),
        cost_estimate=cost,
    )(x2d)

    out_flat = out2d.reshape(-1)
    if pad:
        out_flat = out_flat[:n]
    return out_flat.reshape(orig_shape)


def envelope_ref(inputs, exponent):
    """Pure-JAX reference matching the PyTorch forward exactly."""
    p = exponent + 1
    a = -(p + 1) * (p + 2) / 2.0
    b = float(p * (p + 2))
    c = -p * (p + 1) / 2.0
    inputs = inputs.astype(jnp.float32) if not jnp.issubdtype(
        inputs.dtype, jnp.floating) else inputs
    env_val = (1.0 / inputs
               + a * inputs ** (p - 1)
               + b * inputs ** p
               + c * inputs ** (p + 1))
    return jnp.where(inputs < 1, env_val, jnp.zeros_like(env_val))


if __name__ == "__main__":
    key = jax.random.PRNGKey(0)
    # distances-like input; NCHW-shaped example: batch=2, channels=4, 16x16
    x = jax.random.uniform(key, (2, 4, 16, 16), dtype=jnp.float32,
                           minval=0.05, maxval=2.0)
    exponent = 5

    out = envelope(x, exponent)
    out = jax.block_until_ready(out)

    ref = envelope_ref(x, exponent)
    assert out.shape == x.shape and out.dtype == x.dtype
    # atol=1e-4: the Horner factorization reassociates the f32 polynomial whose
    # O(50)-magnitude terms cancel near x -> 1, so it rounds slightly
    # differently from the separate-powers reference (benign, few-ulp-of-50).
    assert jnp.allclose(out, ref, rtol=1e-5, atol=1e-4), "mismatch vs reference"

    print("KERNEL_OK")
</pallas_src>

<mosaic_0001>
module attributes {stable_mosaic.version = 11 : i64} {
  func.func @_envelope_kernel(%arg0: i32, %arg1: memref<1x2048xf32, #tpu.memory_space<vmem>>, %arg2: memref<1x2048xf32, #tpu.memory_space<vmem>>) attributes {dimension_semantics = [#tpu.dimension_semantics<parallel>], iteration_bounds = array<i64: 1>, scalar_prefetch = 0 : i64, scratch_operands = 0 : i64, tpu.core_type = #tpu.core_type<tc>, window_params = [{transform_indices = @transform_0, window_bounds = array<i64: 1, 2048>}, {transform_indices = @transform_1, window_bounds = array<i64: 1, 2048>}]} {
    %c0 = arith.constant 0 : index
    %c0_0 = arith.constant 0 : index
    %0 = vector.load %arg1[%c0, %c0_0] : memref<1x2048xf32, #tpu.memory_space<vmem>>, vector<1x2048xf32>
    %1 = tpu.reciprocal %0 : vector<1x2048xf32> -> vector<1x2048xf32>
    %2 = arith.mulf %0, %0 : vector<1x2048xf32>
    %3 = arith.mulf %2, %2 : vector<1x2048xf32>
    %4 = arith.mulf %3, %0 : vector<1x2048xf32>
    %cst = arith.constant -2.100000e+01 : f32
    %5 = vector.broadcast %cst : f32 to vector<1x2048xf32>
    %6 = arith.mulf %5, %0 : vector<1x2048xf32>
    %cst_1 = arith.constant 4.800000e+01 : f32
    %7 = vector.broadcast %cst_1 : f32 to vector<1x2048xf32>
    %8 = arith.addf %7, %6 : vector<1x2048xf32>
    %9 = arith.mulf %0, %8 : vector<1x2048xf32>
    %cst_2 = arith.constant -2.800000e+01 : f32
    %10 = vector.broadcast %cst_2 : f32 to vector<1x2048xf32>
    %11 = arith.addf %10, %9 : vector<1x2048xf32>
    %12 = arith.mulf %4, %11 : vector<1x2048xf32>
    %13 = arith.addf %1, %12 : vector<1x2048xf32>
    %cst_3 = arith.constant 1.000000e+00 : f32
    %14 = vector.broadcast %cst_3 : f32 to vector<1x2048xf32>
    %15 = arith.cmpf olt, %0, %14 : vector<1x2048xf32>
    %cst_4 = arith.constant 0.000000e+00 : f32
    %16 = vector.broadcast %cst_4 : f32 to vector<1x2048xf32>
    %17 = arith.select %15, %13, %16 : vector<1x2048xi1>, vector<1x2048xf32>
    %c0_5 = arith.constant 0 : index
    %c0_6 = arith.constant 0 : index
    %18 = vector.load %arg2[%c0_5, %c0_6] : memref<1x2048xf32, #tpu.memory_space<vmem>>, vector<1x2048xf32>
    tpu.vector_store %arg2[%c0_5, %c0_6], %17 {strides = array<i32>} : memref<1x2048xf32, #tpu.memory_space<vmem>>, vector<1x2048xf32>,
    return
  }
  func.func @transform_0(%arg0: i32) -> (i32, i32) {
    %c0_i32 = arith.constant 0 : i32
    %c0_i32_0 = arith.constant 0 : i32
    return %arg0, %c0_i32 : i32, i32
  }
  func.func @transform_1(%arg0: i32) -> (i32, i32) {
    %c0_i32 = arith.constant 0 : i32
    %c0_i32_0 = arith.constant 0 : i32
    return %arg0, %c0_i32 : i32, i32
  }
}

</mosaic_0001>

<bundles_post_ra>
// kernel: tpu_custom_call.1
= control target key start
LH: loop header
LB: loop body
LE: loop exit
PB: predicated region body
PF: predicated region fallthrough
CT: control target
= control target key end

     0   :  { %6 = vsyncpa [#allocation3], 0  ;;  %s154_s0 = inlined_call_operand.hbm [shape: f32[1,2048], index: 0, kind: input, shape index: {}]   ;;  %s155_s1 = inlined_call_operand.hbm [shape: f32[1,2048], index: 1, kind: output, shape index: {}]  }
   0x1   :  { %7 = vsyncpa [#allocation4], 0  ;;  %s118_s6 = smov [#allocation2]   ;;  %s70_s10 = scalar_lea.hbm %s154_s0, 256 }
   0x2   :  { %s14_s7 = sshll.u32 %s118_s6, 4  ;;  %p71_p0 = scmp.ne.s32.totalorder %s154_s0, %s70_s10  ;;  %s15_s7 = int_to_ptr.vmem [resolvable:$true] %s14_s7 }
   0x3   :  { %p74_p1 = scmp.lt.u32.totalorder %s70_s10, %s154_s0 }
   0x5   :  { %p76_p2 = pnand %p74_p1, %p71_p0 }
   0x7   :  { %79 = shalt.err (!%p76_p2)
}
   0x8   :  { %s80_s15 = scalar_lea.vmem %s15_s7, 256  ;;  %p85_p4 = scmp.lt.s32.totalorder %s15_s7, %s15_s7 }
   0x9   :  { %p81_p3 = scmp.ne.s32.totalorder %s15_s7, %s80_s15  ;;  %p86_p5 = scmp.lt.s32.totalorder %s80_s15, %s80_s15 }
   0xb   :  { %p87_p6 = por %p86_p5, %p85_p4 }
   0xd   :  { %p88_p7 = pnand %p87_p6, %p81_p3 }
   0xf   :  { %91 = shalt.err (!%p88_p7)
}
  0x10   :  { %17 = dma.hbm_to_vmem [thread:$0]  %s154_s0, 256, %s15_s7, [#allocation3]  }
  0x11   :  { %114 = dma.done.wait [#allocation3], 256  }
  0x12   :  { %115 = vsyncadd [#allocation3], 4294967040  ;;  %v21_v0 = vld [vmem:[#allocation2] sm:$0xff]  ;;  %v22_v1 = vld [vmem:[#allocation2 + $0x8] sm:$0xff]  ;;  %s119_s0 = smov [#allocation5]  }
  0x13   :  { %66 = vrcp.f32 %v21_v0  ;;  %v25_v2 = vmul.f32 %v21_v0, %v21_v0  ;;  %v31_v3 = vmul.f32 -21.0, %v21_v0  ;;  %v26_v4 = vmul.f32 %v22_v1, %v22_v1  ;;  %s55_s18 = sshll.u32 %s119_s0, 4  ;;  %s56_s18 = int_to_ptr.vmem [resolvable:$true] %s55_s18 }
  0x14   :  { %68 = vrcp.f32 %v22_v1  ;;  %v32_v5 = vmul.f32 -21.0, %v22_v1  ;;  %vm43_vm0 = vcmp.lt.f32.partialorder %v21_v0, 1.0  ;;  %vm44_vm1 = vcmp.lt.f32.partialorder %v22_v1, 1.0  ;;  %s92_s19 = scalar_lea.vmem %s56_s18, 256  ;;  %p97_p9 = scmp.lt.s32.totalorder %s56_s18, %s56_s18 }
  0x15   :  { %v27_v6 = vmul.f32 %v25_v2, %v25_v2  ;;  %v33_v7 = vadd.f32 48.0, %v31_v3  ;;  %v28_v8 = vmul.f32 %v26_v4, %v26_v4  ;;  %p93_p8 = scmp.ne.s32.totalorder %s56_s18, %s92_s19  ;;  %p98_p10 = scmp.lt.s32.totalorder %s92_s19, %s92_s19 }
  0x16   :  { %v34_v9 = vadd.f32 48.0, %v32_v5 }
  0x17   :  { %v29_v10 = vmul.f32 %v27_v6, %v21_v0  ;;  %v35_v11 = vmul.f32 %v33_v7, %v21_v0  ;;  %v30_v12 = vmul.f32 %v28_v8, %v22_v1  ;;  %p99_p11 = por %p98_p10, %p97_p9 }
  0x18   :  { %v36_v13 = vmul.f32 %v34_v9, %v22_v1 }
  0x19   :  { %v37_v14 = vadd.f32 -28.0, %v35_v11  ;;  %p100_p12 = pnand %p99_p11, %p93_p8 }
  0x1a   :  { %v38_v15 = vadd.f32 -28.0, %v36_v13 }
  0x1b   :  { %v39_v16 = vmul.f32 %v37_v14, %v29_v10 }
  0x1c   :  { %v40_v17 = vmul.f32 %v38_v15, %v30_v12 }
  0x1d   :  { %v67_v18 = vpop.eup %66 }
  0x1e   :  { %v69_v19 = vpop.eup %68  ;;  %v41_v20 = vadd.f32 %v67_v18, %v39_v16 }
  0x1f   :  { %v42_v21 = vadd.f32 %v69_v19, %v40_v17 }
  0x20   :  { %v45_v22 = vsel %vm43_vm0, %v41_v20, 0.0 }
  0x21   :  { %47 = vst [vmem:[#allocation5] sm:$0xff] %v45_v22  ;;  %v46_v23 = vsel %vm44_vm1, %v42_v21, 0.0 }
  0x22   :  { %48 = vst [vmem:[#allocation5 + $0x8] sm:$0xff] %v46_v23 }
  0x23   :  { %103 = shalt.err (!%p100_p12)
}
  0x24   :  { %s104_s22 = scalar_lea.hbm %s155_s1, 256 }
  0x25   :  { %p105_p13 = scmp.ne.s32.totalorder %s155_s1, %s104_s22  ;;  %p108_p0 = scmp.lt.u32.totalorder %s104_s22, %s155_s1 }
  0x27   :  { %p110_p1 = pnand %p108_p0, %p105_p13 }
  0x29   :  { %113 = shalt.err (!%p110_p1)
}
  0x2a   :  { %58 = dma.vmem_to_hbm [thread:$0]  %s56_s18, 256, %s155_s1, [#allocation4]  }
  0x2b   :  { %116 = dma.done.wait [#allocation4], 256  }
  0x2c   :  { %117 = vsyncadd [#allocation4], 4294967040 }
  0x2d   :  { %62 = vsyncpa [#allocation3], 1 }
  0x2e   :  { %63 = vsyncpa [#allocation4], 1 }

</bundles_post_ra>
